<compile_context>
chip_gen: v6e
topology: v6e:2x2x1
jax: 0.10.0
libtpu: 0.0.40
codegen_flags: <defaults>
</compile_context>

<pallas_src>
import functools

import jax
import jax.numpy as jnp
from jax.experimental import pallas as pl
from jax.experimental.pallas import tpu as pltpu


def _patch_merging_kernel(x_ref, ga_ref, ba_ref, gb_ref, bb_ref,
                          wa_ref, wb_ref, o_ref, *, eps):
    # x_ref : (tr, 2, W2, 2C)  two image rows per merged row, channels-last
    # ga/ba : (1, 2C)  LayerNorm affine for the hp=0 half ([x0 | x2] channels)
    # gb/bb : (1, 2C)  LayerNorm affine for the hp=1 half ([x1 | x3] channels)
    # wa/wb : (2C, 2C_out)  reduction-weight rows for the two halves
    # o_ref : (tr, W2, 2C_out)
    tr, _, w2, c2 = x_ref.shape
    rows = tr * w2

    xt = x_ref[...]
    # hp=0 rows hold [x0 | x2] channels, hp=1 rows hold [x1 | x3] channels.
    a = xt[:, 0, :, :].reshape(rows, c2).astype(jnp.float32)
    b = xt[:, 1, :, :].reshape(rows, c2).astype(jnp.float32)

    # LayerNorm over the full 4C merged channel dim (split across a and b).
    inv_n = 1.0 / (2 * c2)
    mu = (jnp.sum(a, axis=-1, keepdims=True)
          + jnp.sum(b, axis=-1, keepdims=True)) * inv_n
    ac = a - mu
    bc = b - mu
    var = (jnp.sum(ac * ac, axis=-1, keepdims=True)
           + jnp.sum(bc * bc, axis=-1, keepdims=True)) * inv_n
    inv_std = jax.lax.rsqrt(var + eps)
    an = ac * inv_std * ga_ref[...] + ba_ref[...]
    bn = bc * inv_std * gb_ref[...] + bb_ref[...]

    # Bias-free reduction: merged @ W == a_half @ Wa + b_half @ Wb.
    cd = wa_ref.dtype  # pass bf16 weights/x for native MXU rate; f32 accum.
    out = jnp.dot(an.astype(cd), wa_ref[...], preferred_element_type=jnp.float32)
    out = out + jnp.dot(bn.astype(cd), wb_ref[...], preferred_element_type=jnp.float32)

    o_ref[...] = out.reshape(tr, w2, out.shape[-1]).astype(o_ref.dtype)


@functools.partial(jax.jit, static_argnames=("eps", "rows_per_tile"))
def patch_merging_pallas(x, gamma, beta, weight, *, eps=1e-5, rows_per_tile=256):
    """PatchMerging forward.

    x      : (B, H, W, C) channels-last
    gamma  : (4C,) LayerNorm weight   (torch channel order [x0, x1, x2, x3])
    beta   : (4C,) LayerNorm bias
    weight : (4C, 2C) reduction matrix (== torch nn.Linear.weight.T), no bias
    returns (B, ceil(H/2), ceil(W/2), 2C)
    """
    B, H, W, C = x.shape
    c2, c4, c_out = 2 * C, 4 * C, 2 * C
    assert gamma.shape == (c4,) and beta.shape == (c4,) and weight.shape == (c4, c_out)

    # padding(): pad H/W up to even with zeros (same as F.pad in the module).
    ph, pw = H % 2, W % 2
    if ph or pw:
        x = jnp.pad(x, ((0, 0), (0, ph), (0, pw), (0, 0)))
        H, W = H + ph, W + pw
    h2, w2 = H // 2, W // 2
    R = B * h2                                # number of merged output rows / W2

    # Free (row-major) reshape: (B, H, W, C) -> (R, 2, W2, 2C).
    # In the last dim, [:C] is the even-w pixel, [C:] is the odd-w pixel.
    x_r = x.reshape(R, 2, w2, c2)

    # Fold the torch concat order [x0, x1, x2, x3] into the params:
    #   hp=0 half carries [x0 | x2] channels, hp=1 half carries [x1 | x3].
    ga = jnp.concatenate([gamma[0:C], gamma[2 * C:3 * C]]).reshape(1, c2)
    gb = jnp.concatenate([gamma[C:2 * C], gamma[3 * C:4 * C]]).reshape(1, c2)
    ba = jnp.concatenate([beta[0:C], beta[2 * C:3 * C]]).reshape(1, c2)
    bb = jnp.concatenate([beta[C:2 * C], beta[3 * C:4 * C]]).reshape(1, c2)
    wa = jnp.concatenate([weight[0:C], weight[2 * C:3 * C]], axis=0)   # (2C, 2C)
    wb = jnp.concatenate([weight[C:2 * C], weight[3 * C:4 * C]], axis=0)

    # Row-pair tile: target ~rows_per_tile merged rows per grid step, keep
    # >=2 grid steps (v7x has 2 TensorCores), and keep the in-kernel
    # (tr, W2, .) <-> (tr*W2, .) reshapes layout-free.
    tr = max(1, min(R, rows_per_tile // max(w2, 1)))
    if R >= 2:
        tr = min(tr, max(1, R // 2))
    if w2 % 8 != 0:
        tr = 1
    while R % tr:
        tr -= 1

    # Explicit VMEM budget: double-buffered x/out tiles + resident params.
    isz = x.dtype.itemsize
    est = (2 * (tr * 2 * w2 * c2 + tr * w2 * c_out) * isz
           + (2 * c2 * c_out + 4 * c2) * weight.dtype.itemsize)
    vmem_limit = int(min(48 * 2**20, max(4 * est, 16 * 2**20)))

    out = pl.pallas_call(
        functools.partial(_patch_merging_kernel, eps=eps),
        out_shape=jax.ShapeDtypeStruct((R, w2, c_out), x.dtype),
        grid_spec=pltpu.PrefetchScalarGridSpec(
            num_scalar_prefetch=0,
            grid=(R // tr,),
            in_specs=[
                pl.BlockSpec((tr, 2, w2, c2), lambda i: (i, 0, 0, 0)),  # x tile
                pl.BlockSpec((1, c2), lambda i: (0, 0)),                # gamma_a
                pl.BlockSpec((1, c2), lambda i: (0, 0)),                # beta_a
                pl.BlockSpec((1, c2), lambda i: (0, 0)),                # gamma_b
                pl.BlockSpec((1, c2), lambda i: (0, 0)),                # beta_b
                pl.BlockSpec((c2, c_out), lambda i: (0, 0)),            # Wa
                pl.BlockSpec((c2, c_out), lambda i: (0, 0)),            # Wb
            ],
            out_specs=pl.BlockSpec((tr, w2, c_out), lambda i: (i, 0, 0)),
        ),
        compiler_params=pltpu.CompilerParams(
            dimension_semantics=("parallel",),
            vmem_limit_bytes=vmem_limit,
        ),
    )(x_r, ga, ba, gb, bb, wa, wb)

    return out.reshape(B, h2, w2, c_out)


def _reference(x, gamma, beta, weight, eps=1e-5):
    """Pure-JAX mirror of the PyTorch PatchMerging.forward (eval)."""
    _, H, W, _ = x.shape
    ph, pw = H % 2, W % 2
    if ph or pw:
        x = jnp.pad(x, ((0, 0), (0, ph), (0, pw), (0, 0)))
    x0 = x[:, 0::2, 0::2, :]
    x1 = x[:, 1::2, 0::2, :]
    x2 = x[:, 0::2, 1::2, :]
    x3 = x[:, 1::2, 1::2, :]
    m = jnp.concatenate([x0, x1, x2, x3], axis=-1)
    mu = jnp.mean(m, axis=-1, keepdims=True)
    var = jnp.mean((m - mu) ** 2, axis=-1, keepdims=True)
    mn = (m - mu) / jnp.sqrt(var + eps) * gamma + beta
    return jnp.einsum("bhwk,kn->bhwn", mn, weight,
                      precision=jax.lax.Precision.HIGHEST)


if __name__ == "__main__":
    key = jax.random.PRNGKey(0)
    k1, k2, k3, k4 = jax.random.split(key, 4)

    # Case 1: even spatial dims. B=2, H=W=16, C=16 -> out (2, 8, 8, 32).
    B, H, W, C = 2, 16, 16, 16
    x = jax.random.normal(k1, (B, H, W, C), jnp.float32)
    gamma = 1.0 + 0.1 * jax.random.normal(k2, (4 * C,), jnp.float32)
    beta = 0.1 * jax.random.normal(k3, (4 * C,), jnp.float32)
    bound = 1.0 / (4 * C) ** 0.5
    weight = jax.random.uniform(k4, (4 * C, 2 * C), jnp.float32, -bound, bound)

    out = jax.block_until_ready(patch_merging_pallas(x, gamma, beta, weight))
    ref = _reference(x, gamma, beta, weight)
    assert out.shape == (B, H // 2, W // 2, 2 * C)
    assert jnp.allclose(out, ref, atol=2e-3, rtol=2e-3)

    # Case 2: odd H exercises the padding path (and the tr=1 fallback).
    B2, H2_, W2_, C2_ = 1, 7, 12, 8
    xb = jax.random.normal(k2, (B2, H2_, W2_, C2_), jnp.float32)
    gammab = 1.0 + 0.1 * jax.random.normal(k3, (4 * C2_,), jnp.float32)
    betab = 0.1 * jax.random.normal(k4, (4 * C2_,), jnp.float32)
    boundb = 1.0 / (4 * C2_) ** 0.5
    weightb = jax.random.uniform(k1, (4 * C2_, 2 * C2_), jnp.float32, -boundb, boundb)

    outb = jax.block_until_ready(patch_merging_pallas(xb, gammab, betab, weightb))
    refb = _reference(xb, gammab, betab, weightb)
    assert outb.shape == (B2, (H2_ + 1) // 2, W2_ // 2, 2 * C2_)
    assert jnp.allclose(outb, refb, atol=2e-3, rtol=2e-3)

    print("KERNEL_OK")
</pallas_src>

<mosaic_0001>
module attributes {stable_mosaic.version = 11 : i64} {
  func.func @_patch_merging_kernel(%arg0: i32, %arg1: memref<8x2x8x32xf32, #tpu.memory_space<vmem>>, %arg2: memref<1x32xf32, #tpu.memory_space<vmem>>, %arg3: memref<1x32xf32, #tpu.memory_space<vmem>>, %arg4: memref<1x32xf32, #tpu.memory_space<vmem>>, %arg5: memref<1x32xf32, #tpu.memory_space<vmem>>, %arg6: memref<32x32xf32, #tpu.memory_space<vmem>>, %arg7: memref<32x32xf32, #tpu.memory_space<vmem>>, %arg8: memref<8x8x32xf32, #tpu.memory_space<vmem>>) attributes {dimension_semantics = [#tpu.dimension_semantics<parallel>], iteration_bounds = array<i64: 2>, scalar_prefetch = 0 : i64, scratch_operands = 0 : i64, tpu.core_type = #tpu.core_type<tc>, window_params = [{transform_indices = @transform_0, window_bounds = array<i64: 8, 2, 8, 32>}, {pipeline_mode = #tpu.pipeline_mode<synchronous>, transform_indices = @transform_1, window_bounds = array<i64: 1, 32>}, {pipeline_mode = #tpu.pipeline_mode<synchronous>, transform_indices = @transform_2, window_bounds = array<i64: 1, 32>}, {pipeline_mode = #tpu.pipeline_mode<synchronous>, transform_indices = @transform_3, window_bounds = array<i64: 1, 32>}, {pipeline_mode = #tpu.pipeline_mode<synchronous>, transform_indices = @transform_4, window_bounds = array<i64: 1, 32>}, {pipeline_mode = #tpu.pipeline_mode<synchronous>, transform_indices = @transform_5, window_bounds = array<i64: 32, 32>}, {pipeline_mode = #tpu.pipeline_mode<synchronous>, transform_indices = @transform_6, window_bounds = array<i64: 32, 32>}, {transform_indices = @transform_7, window_bounds = array<i64: 8, 8, 32>}]} {
    %c0 = arith.constant 0 : index
    %c0_0 = arith.constant 0 : index
    %c0_1 = arith.constant 0 : index
    %c0_2 = arith.constant 0 : index
    %0 = vector.load %arg1[%c0, %c0_0, %c0_1, %c0_2] : memref<8x2x8x32xf32, #tpu.memory_space<vmem>>, vector<8x2x8x32xf32>
    %1 = vector.extract_strided_slice %0 {offsets = [0, 0, 0, 0], sizes = [8, 1, 8, 32], strides = [1, 1, 1, 1]} : vector<8x2x8x32xf32> to vector<8x1x8x32xf32>
    %2 = vector.shape_cast %1 : vector<8x1x8x32xf32> to vector<8x8x32xf32>
    %3 = vector.shape_cast %2 : vector<8x8x32xf32> to vector<64x32xf32>
    %4 = vector.extract_strided_slice %0 {offsets = [0, 1, 0, 0], sizes = [8, 1, 8, 32], strides = [1, 1, 1, 1]} : vector<8x2x8x32xf32> to vector<8x1x8x32xf32>
    %5 = vector.shape_cast %4 : vector<8x1x8x32xf32> to vector<8x8x32xf32>
    %6 = vector.shape_cast %5 : vector<8x8x32xf32> to vector<64x32xf32>
    %cst = arith.constant dense<0.000000e+00> : vector<64xf32>
    %7 = vector.multi_reduction <add>, %3, %cst [1] : vector<64x32xf32> to vector<64xf32>
    %8 = vector.shape_cast %7 : vector<64xf32> to vector<64x1xf32>
    %cst_3 = arith.constant dense<0.000000e+00> : vector<64xf32>
    %9 = vector.multi_reduction <add>, %6, %cst_3 [1] : vector<64x32xf32> to vector<64xf32>
    %10 = vector.shape_cast %9 : vector<64xf32> to vector<64x1xf32>
    %11 = arith.addf %8, %10 : vector<64x1xf32>
    %cst_4 = arith.constant 1.562500e-02 : f32
    %12 = vector.broadcast %cst_4 : f32 to vector<64x1xf32>
    %13 = arith.mulf %11, %12 : vector<64x1xf32>
    %14 = vector.broadcast %13 : vector<64x1xf32> to vector<64x32xf32>
    %15 = arith.subf %3, %14 : vector<64x32xf32>
    %16 = vector.broadcast %13 : vector<64x1xf32> to vector<64x32xf32>
    %17 = arith.subf %6, %16 : vector<64x32xf32>
    %18 = arith.mulf %15, %15 : vector<64x32xf32>
    %cst_5 = arith.constant dense<0.000000e+00> : vector<64xf32>
    %19 = vector.multi_reduction <add>, %18, %cst_5 [1] : vector<64x32xf32> to vector<64xf32>
    %20 = vector.shape_cast %19 : vector<64xf32> to vector<64x1xf32>
    %21 = arith.mulf %17, %17 : vector<64x32xf32>
    %cst_6 = arith.constant dense<0.000000e+00> : vector<64xf32>
    %22 = vector.multi_reduction <add>, %21, %cst_6 [1] : vector<64x32xf32> to vector<64xf32>
    %23 = vector.shape_cast %22 : vector<64xf32> to vector<64x1xf32>
    %24 = arith.addf %20, %23 : vector<64x1xf32>
    %cst_7 = arith.constant 1.562500e-02 : f32
    %25 = vector.broadcast %cst_7 : f32 to vector<64x1xf32>
    %26 = arith.mulf %24, %25 : vector<64x1xf32>
    %cst_8 = arith.constant 9.99999974E-6 : f32
    %27 = vector.broadcast %cst_8 : f32 to vector<64x1xf32>
    %28 = arith.addf %26, %27 : vector<64x1xf32>
    %29 = math.rsqrt %28 : vector<64x1xf32>
    %30 = vector.broadcast %29 : vector<64x1xf32> to vector<64x32xf32>
    %31 = arith.mulf %15, %30 : vector<64x32xf32>
    %c0_9 = arith.constant 0 : index
    %c0_10 = arith.constant 0 : index
    %32 = vector.load %arg2[%c0_9, %c0_10] : memref<1x32xf32, #tpu.memory_space<vmem>>, vector<1x32xf32>
    %33 = vector.broadcast %32 : vector<1x32xf32> to vector<64x32xf32>
    %34 = arith.mulf %31, %33 : vector<64x32xf32>
    %c0_11 = arith.constant 0 : index
    %c0_12 = arith.constant 0 : index
    %35 = vector.load %arg3[%c0_11, %c0_12] : memref<1x32xf32, #tpu.memory_space<vmem>>, vector<1x32xf32>
    %36 = vector.broadcast %35 : vector<1x32xf32> to vector<64x32xf32>
    %37 = arith.addf %34, %36 : vector<64x32xf32>
    %38 = vector.broadcast %29 : vector<64x1xf32> to vector<64x32xf32>
    %39 = arith.mulf %17, %38 : vector<64x32xf32>
    %c0_13 = arith.constant 0 : index
    %c0_14 = arith.constant 0 : index
    %40 = vector.load %arg4[%c0_13, %c0_14] : memref<1x32xf32, #tpu.memory_space<vmem>>, vector<1x32xf32>
    %41 = vector.broadcast %40 : vector<1x32xf32> to vector<64x32xf32>
    %42 = arith.mulf %39, %41 : vector<64x32xf32>
    %c0_15 = arith.constant 0 : index
    %c0_16 = arith.constant 0 : index
    %43 = vector.load %arg5[%c0_15, %c0_16] : memref<1x32xf32, #tpu.memory_space<vmem>>, vector<1x32xf32>
    %44 = vector.broadcast %43 : vector<1x32xf32> to vector<64x32xf32>
    %45 = arith.addf %42, %44 : vector<64x32xf32>
    %c0_17 = arith.constant 0 : index
    %c0_18 = arith.constant 0 : index
    %46 = vector.load %arg6[%c0_17, %c0_18] : memref<32x32xf32, #tpu.memory_space<vmem>>, vector<32x32xf32>
    %cst_19 = arith.constant dense<0.000000e+00> : vector<64x32xf32>
    %47 = tpu.matmul %37, %46, %cst_19 {dimension_numbers = #tpu.dot_dimension_numbers<[1], [0], [0], [1], [0, 0, 1, 1], [], []>} : vector<64x32xf32>, vector<32x32xf32>, vector<64x32xf32> -> vector<64x32xf32>
    %c0_20 = arith.constant 0 : index
    %c0_21 = arith.constant 0 : index
    %48 = vector.load %arg7[%c0_20, %c0_21] : memref<32x32xf32, #tpu.memory_space<vmem>>, vector<32x32xf32>
    %cst_22 = arith.constant dense<0.000000e+00> : vector<64x32xf32>
    %49 = tpu.matmul %45, %48, %cst_22 {dimension_numbers = #tpu.dot_dimension_numbers<[1], [0], [0], [1], [0, 0, 1, 1], [], []>} : vector<64x32xf32>, vector<32x32xf32>, vector<64x32xf32> -> vector<64x32xf32>
    %50 = arith.addf %47, %49 : vector<64x32xf32>
    %51 = vector.shape_cast %50 : vector<64x32xf32> to vector<8x8x32xf32>
    %c0_23 = arith.constant 0 : index
    %c0_24 = arith.constant 0 : index
    %c0_25 = arith.constant 0 : index
    %52 = vector.load %arg8[%c0_23, %c0_24, %c0_25] : memref<8x8x32xf32, #tpu.memory_space<vmem>>, vector<8x8x32xf32>
    tpu.vector_store %arg8[%c0_23, %c0_24, %c0_25], %51 {strides = array<i32>} : memref<8x8x32xf32, #tpu.memory_space<vmem>>, vector<8x8x32xf32>,
    return
  }
  func.func @transform_0(%arg0: i32) -> (i32, i32, i32, i32) {
    %c0_i32 = arith.constant 0 : i32
    %c0_i32_0 = arith.constant 0 : i32
    %c0_i32_1 = arith.constant 0 : i32
    %c0_i32_2 = arith.constant 0 : i32
    return %arg0, %c0_i32, %c0_i32_0, %c0_i32_1 : i32, i32, i32, i32
  }
  func.func @transform_1(%arg0: i32) -> (i32, i32) {
    %c0_i32 = arith.constant 0 : i32
    %c0_i32_0 = arith.constant 0 : i32
    %c0_i32_1 = arith.constant 0 : i32
    return %c0_i32, %c0_i32_0 : i32, i32
  }
  func.func @transform_2(%arg0: i32) -> (i32, i32) {
    %c0_i32 = arith.constant 0 : i32
    %c0_i32_0 = arith.constant 0 : i32
    %c0_i32_1 = arith.constant 0 : i32
    return %c0_i32, %c0_i32_0 : i32, i32
  }
  func.func @transform_3(%arg0: i32) -> (i32, i32) {
    %c0_i32 = arith.constant 0 : i32
    %c0_i32_0 = arith.constant 0 : i32
    %c0_i32_1 = arith.constant 0 : i32
    return %c0_i32, %c0_i32_0 : i32, i32
  }
  func.func @transform_4(%arg0: i32) -> (i32, i32) {
    %c0_i32 = arith.constant 0 : i32
    %c0_i32_0 = arith.constant 0 : i32
    %c0_i32_1 = arith.constant 0 : i32
    return %c0_i32, %c0_i32_0 : i32, i32
  }
  func.func @transform_5(%arg0: i32) -> (i32, i32) {
    %c0_i32 = arith.constant 0 : i32
    %c0_i32_0 = arith.constant 0 : i32
    %c0_i32_1 = arith.constant 0 : i32
    return %c0_i32, %c0_i32_0 : i32, i32
  }
  func.func @transform_6(%arg0: i32) -> (i32, i32) {
    %c0_i32 = arith.constant 0 : i32
    %c0_i32_0 = arith.constant 0 : i32
    %c0_i32_1 = arith.constant 0 : i32
    return %c0_i32, %c0_i32_0 : i32, i32
  }
  func.func @transform_7(%arg0: i32) -> (i32, i32, i32) {
    %c0_i32 = arith.constant 0 : i32
    %c0_i32_0 = arith.constant 0 : i32
    %c0_i32_1 = arith.constant 0 : i32
    return %arg0, %c0_i32, %c0_i32_0 : i32, i32, i32
  }
}

</mosaic_0001>

<bundles_post_ra>
// kernel: patch_merging_pallas.1
= control target key start
LH: loop header
LB: loop body
LE: loop exit
PB: predicated region body
PF: predicated region fallthrough
CT: control target
= control target key end

     0   :  { %12 = vsyncpa [#allocation3], 0  ;;  %s1553_s0 = inlined_call_operand.vmem [shape: f32[16,2,8,32], index: 0, kind: input, shape index: {}]   ;;  %s1554_s1 = inlined_call_operand.vmem [shape: f32[1,32], index: 1, kind: input, shape index: {}]   ;;  %s1555_s2 = inlined_call_operand.vmem [shape: f32[1,32], index: 2, kind: input, shape index: {}]   ;;  %s1556_s3 = inlined_call_operand.vmem [shape: f32[1,32], index: 3, kind: input, shape index: {}]   ;;  %s1557_s4 = inlined_call_operand.vmem [shape: f32[1,32], index: 4, kind: input, shape index: {}]   ;;  %s1558_s5 = inlined_call_operand.vmem [shape: f32[32,32], index: 5, kind: input, shape index: {}]   ;;  %s1559_s6 = inlined_call_operand.vmem [shape: f32[32,32], index: 6, kind: input, shape index: {}]   ;;  %s1560_s7 = inlined_call_operand.hbm [shape: f32[16,8,32], index: 7, kind: output, shape index: {}]  }
   0x1   :  { %14 = vsyncpa [#allocation3 + $0x1], 0  ;;  %s1163_s24 = smov 0   ;;  %s1165_s25 = smov 0  }
   0x2   :  { %s1167_s26 = smov 0   ;;  %s1169_s27 = smov 0  }
   0x3 LB: > { %s1184_s28 = sadd.s32 4294967295, %s1118_s27   ;;  %s902_s29 = sadd.s32 4294967294, %s1118_s27   ;;  %s1118_s27 = sphi %s1169_s27, %s1566_s27   ;;  %s1114_s26 = sphi %s1167_s26, %s1565_s26   ;;  %s1110_s25 = sphi %s1165_s25, %s1564_s25   ;;  %s1106_s24 = sphi %s1163_s24, %s1563_s24  }
   0x4   : > { %s1188_s30 = sadd.s32 1, %s1118_s27   ;;  %s179_s8 = sadd.s32 1, %s1114_s26 }
   0x5   : > { %s176_s9 = ssub.s32 %s1118_s27, %s1188_s30  ;;  %p189_p0 = scmp.ne.s32.totalorder %s1114_s26, %s1110_s25 }
   0x6   : > { %p177_p1 = scmp.eq.s32.totalorder %s176_s9, 0  ;;  %p190_p2 = scmp.eq.s32.totalorder %s1184_s28, 1 }
   0x7   : > { %p195_p3 = scmp.ne.s32.totalorder %s1110_s25, %s1106_s24  ;;  %p196_p4 = scmp.eq.s32.totalorder %s902_s29, 1 }
   0x8   : > { %s1199_s10 = scalar_select %p177_p1, %s1114_s26, %s179_s8  }
   0x9   : > { %p1201_p5 = por %p190_p2, %p189_p0  ;;  %p1205_p6 = por %p196_p4, %p195_p3 }
   0xa   : > { %p905_p7 = scmp.ge.s32.totalorder %s1118_s27, 1  ;;  %p242_p8 = scmp.lt.s32.totalorder %s1118_s27, 3 }
   0xc   : > { %p243_p9 = pnand %p905_p7, %p242_p8 }
   0xd   : > { %s907_s13 = sshll.u32 (!%p243_p9), %s1184_s28, 3  ;;  %s1120_s23 = smov (!%p243_p9), [#allocation2]  }
   0xe   : > { %246 = sbr.rel (%p243_p9) target bundleno = 579 (0x243), region = 48  ;;  %p276_p10 = scmp.lt.s32.totalorder (!%p243_p9), %s907_s13, 15 }
   0xf   : > { %s1062_s29 = sshll.u32 (!%p243_p9), %s1120_s23, 4  ;;  %s1063_s29 = int_to_ptr.vmem [resolvable:$false] %s1062_s29 }
  0x10   : > { %s1064_s8 = scalar_lea.vmem (!%p243_p9), %s1063_s29, 2048 }
  0x13   : > { %s1568_s13 = smov (!%p276_p10, %s907_s13), 15  ;;  %vm299_vm0 = vcmask 261120  }
  0x14   : > { %s935_s14 = sshll.u32 %s1568_s13, 4 }
  0x15   : > { %s1215_s17 = scalar_lea.vmem %s1553_s0, %s935_s14  ;;  %s272_s14 = sand.u32 1, %s1110_s25  }
  0x16   : > { %v285_v0 = vld [vmem:[%s1215_s17 + $0x10] sm:$0xff]  ;;  %v283_v1 = vld [vmem:[%s1215_s17] sm:$0xff]  ;;  %v286_v2 = vld [vmem:[%s1215_s17 + $0x18] sm:$0xff]  ;;  %s906_s15 = sshll.u32 %s272_s14, 6 }
  0x17   : > { %v303_v3 = vsel %vm299_vm0, %v285_v0, 0.0  ;;  %v300_v4 = vsel %vm299_vm0, %v283_v1, 0.0  ;;  %v284_v5 = vld [vmem:[%s1215_s17 + $0x8] sm:$0xff]  ;;  %v327_v6 = vsel %vm299_vm0, %v286_v2, 0.0  ;;  %v287_v9 = vld [vmem:[%s1215_s17 + $0x20] sm:$0xff]  ;;  %v1233_v12 = vld [vmem:[%s1215_s17 + $0x38] sm:$0xff] }
  0x18   : > { %304 = vadd.xlane.f32.xlu1 %v303_v3  ;;  %301 = vadd.xlane.f32.xlu0 %v300_v4  ;;  %v324_v7 = vsel %vm299_vm0, %v284_v5, 0.0  ;;  %v1226_v8 = vld [vmem:[%s1215_s17 + $0x28] sm:$0xff]  ;;  %v306_v11 = vsel %vm299_vm0, %v287_v9, 0.0  ;;  %v1236_v13 = vld [vmem:[%s1215_s17 + $0x30] sm:$0xff]  ;;  %v333_v14 = vsel %vm299_vm0, %v1233_v12, 0.0  ;;  %v1246_v17 = vld [vmem:[%s1215_s17 + $0x40] sm:$0xff] }
  0x19   : > { %v330_v10 = vsel %vm299_vm0, %v1226_v8, 0.0  ;;  %v309_v15 = vsel %vm299_vm0, %v1236_v13, 0.0  ;;  %v1243_v16 = vld [vmem:[%s1215_s17 + $0x48] sm:$0xff]  ;;  %v312_v19 = vsel %vm299_vm0, %v1246_v17, 0.0  ;;  %v1253_v20 = vld [vmem:[%s1215_s17 + $0x58] sm:$0xff]  ;;  %v1256_v21 = vld [vmem:[%s1215_s17 + $0x50] sm:$0xff] }
  0x1a   : > { %v336_v18 = vsel %vm299_vm0, %v1243_v16, 0.0  ;;  %v339_v22 = vsel %vm299_vm0, %v1253_v20, 0.0  ;;  %v315_v23 = vsel %vm299_vm0, %v1256_v21, 0.0  ;;  %v1263_v24 = vld [vmem:[%s1215_s17 + $0x68] sm:$0xff]  ;;  %v1266_v25 = vld [vmem:[%s1215_s17 + $0x60] sm:$0xff]  ;;  %v1273_v28 = vld [vmem:[%s1215_s17 + $0x78] sm:$0xff] }
  0x1b   : > { %v342_v26 = vsel %vm299_vm0, %v1263_v24, 0.0  ;;  %v318_v27 = vsel %vm299_vm0, %v1266_v25, 0.0  ;;  %v1276_v29 = vld [vmem:[%s1215_s17 + $0x70] sm:$0xff]  ;;  %v345_v30 = vsel %vm299_vm0, %v1273_v28, 0.0  ;;  %s1484_s16 = scalar_lea.vmem [#allocation2], %s906_s15  ;;  %s936_s17 = sshll.u32 %s1184_s28, 10 }
  0x1c   : > { %328 = vadd.xlane.f32.xlu1 %v327_v6  ;;  %325 = vadd.xlane.f32.xlu0 %v324_v7  ;;  %v321_v31 = vsel %vm299_vm0, %v1276_v29, 0.0  ;;  %s840_s18 = sshll.u32 %s1484_s16, 4  ;;  %s1503_s21 = scalar_lea.hbm %s1560_s7, %s936_s17  ;;  %s1505_s18 = int_to_ptr.vmem [resolvable:$true] %s840_s18 }
  0x1d   : > { %s1513_s28 = scalar_lea.sflag [#allocation3], %s272_s14  ;;  %s1058_s22 = scalar_lea.vmem %s1505_s18, 1024 }
  0x1e   : > { %p1059_p11 = scmp.ne.s32.totalorder %s1505_s18, %s1058_s22  ;;  %p1065_p0 = scmp.lt.s32.totalorder %s1505_s18, %s1063_s29 }
  0x1f   : > { %p1066_p1 = scmp.lt.s32.totalorder %s1064_s8, %s1058_s22 }
  0x20   : > { %331 = vadd.xlane.f32.xlu1 %v330_v10  ;;  %307 = vadd.xlane.f32.xlu0 %v306_v11  ;;  %p1060_p12 = pnand %p1059_p11, %p1201_p5 }
  0x21   : > { %p1067_p2 = por %p1066_p1, %p1065_p0 }
  0x22   : > { %p1061_p13 = pneg %p1060_p12 }
  0x24   : > { %334 = vadd.xlane.f32.xlu1 %v333_v14  ;;  %310 = vadd.xlane.f32.xlu0 %v309_v15  ;;  %p1068_p3 = pnand %p1067_p2, %p1061_p13 }
  0x28   : > { %337 = vadd.xlane.f32.xlu1 %v336_v18  ;;  %313 = vadd.xlane.f32.xlu0 %v312_v19 }
  0x2c   : > { %340 = vadd.xlane.f32.xlu1 %v339_v22  ;;  %316 = vadd.xlane.f32.xlu0 %v315_v23 }
  0x30   : > { %343 = vadd.xlane.f32.xlu1 %v342_v26  ;;  %319 = vadd.xlane.f32.xlu0 %v318_v27 }
  0x34   : > { %346 = vadd.xlane.f32.xlu1 %v345_v30  ;;  %322 = vadd.xlane.f32.xlu0 %v321_v31 }
  0xa1   : > { %v305_v32 = vpop.xlane.xlu1 %304  ;;  %v302_v33 = vpop.xlane.xlu0 %301 }
  0xa5   : > { %v329_v34 = vpop.xlane.xlu1 %328  ;;  %v326_v35 = vpop.xlane.xlu0 %325 }
  0xa6   : > { %v349_v36 = vadd.f32 %v329_v34, %v305_v32  ;;  %v348_v37 = vadd.f32 %v326_v35, %v302_v33 }
  0xa8   : > { %v357_v38 = vmul.f32 0.015625, %v349_v36  ;;  %v356_v39 = vmul.f32 0.015625, %v348_v37 }
  0xa9   : > { %v332_v40 = vpop.xlane.xlu1 %331  ;;  %v308_v41 = vpop.xlane.xlu0 %307 }
  0xaa   : > { %v1282_v42 = vsub.f32 %v285_v0, %v357_v38  ;;  %v1284_v43 = vsub.f32 %v286_v2, %v357_v38  ;;  %v1286_v44 = vsub.f32 %v283_v1, %v356_v39  ;;  %v1288_v45 = vsub.f32 %v284_v5, %v356_v39 }
  0xab   : > { %v350_v46 = vadd.f32 %v332_v40, %v308_v41 }
  0xac   : > { %v412_v47 = vmul.f32 %v1288_v45, %v1288_v45  ;;  %v380_v48 = vmul.f32 %v1286_v44, %v1286_v44  ;;  %v413_v52 = vmul.f32 %v1284_v43, %v1284_v43  ;;  %v381_v56 = vmul.f32 %v1282_v42, %v1282_v42 }
  0xad   : > { %v358_v49 = vmul.f32 0.015625, %v350_v46  ;;  %v335_v50 = vpop.xlane.xlu1 %334  ;;  %v311_v51 = vpop.xlane.xlu0 %310 }
  0xae   : > { %v420_v53 = vsel %vm299_vm0, %v412_v47, 0.0  ;;  %v388_v54 = vsel %vm299_vm0, %v380_v48, 0.0  ;;  %v351_v55 = vadd.f32 %v335_v50, %v311_v51  ;;  %v423_v60 = vsel %vm299_vm0, %v413_v52, 0.0 }
  0xaf   : > { %v1300_v57 = vsub.f32 %v287_v9, %v358_v49  ;;  %v1303_v58 = vsub.f32 %v1226_v8, %v358_v49  ;;  %421 = vadd.xlane.f32.xlu1 %v420_v53  ;;  %389 = vadd.xlane.f32.xlu0 %v388_v54  ;;  %v391_v3 = vsel %vm299_vm0, %v381_v56, 0.0  ;;  %v555_v53 = vld [vmem:[%s1558_s5 + $0x18] sm:$0xff]  ;;  %v558_v54 = vld [vmem:[%s1559_s6 + $0x10] sm:$0xff]  ;;  %v557_v56 = vld [vmem:[%s1559_s6 + $0x8] sm:$0xff] }
  0xb0   : > { %v359_v59 = vmul.f32 0.015625, %v351_v55  ;;  %981 = vmatprep.subr.mxu1 %v555_v53  ;;  %v554_v55 = vld [vmem:[%s1558_s5 + $0x10] sm:$0xff] }
  0xb1   : > { %v338_v61 = vpop.xlane.xlu1 %337  ;;  %v314_v62 = vpop.xlane.xlu0 %313  ;;  %v414_v63 = vmul.f32 %v1303_v58, %v1303_v58  ;;  %v382_v0 = vmul.f32 %v1300_v57, %v1300_v57  ;;  %982 = vmatpush3.msra.mxu1 %v555_v53 }
  0xb2   : > { %v1311_v1 = vsub.f32 %v1236_v13, %v359_v59  ;;  %v1314_v2 = vsub.f32 %v1233_v12, %v359_v59  ;;  %v352_v4 = vadd.f32 %v338_v61, %v314_v62  ;;  %983 = vmatprep.subr.mxu1 %v554_v55  ;;  %v553_v59 = vld [vmem:[%s1558_s5 + $0x8] sm:$0xff]  ;;  %v552_v61 = vld [vmem:[%s1558_s5] sm:$0xff] }
  0xb3   : > { %424 = vadd.xlane.f32.xlu1 %v423_v60  ;;  %392 = vadd.xlane.f32.xlu0 %v391_v3  ;;  %v426_v5 = vsel %vm299_vm0, %v414_v63, 0.0  ;;  %v394_v7 = vsel %vm299_vm0, %v382_v0, 0.0  ;;  %v556_v60 = vld [vmem:[%s1559_s6] sm:$0xff] }
  0xb4   : > { %v360_v6 = vmul.f32 0.015625, %v352_v4  ;;  %v415_v8 = vmul.f32 %v1314_v2, %v1314_v2  ;;  %v383_v9 = vmul.f32 %v1311_v1, %v1311_v1  ;;  %984 = vmatpush3.msra.mxu1 %v554_v55 }
  0xb5   : > { %v341_v10 = vpop.xlane.xlu1 %340  ;;  %v317_v11 = vpop.xlane.xlu0 %316  ;;  %985 = vmatprep.subr.mxu1 %v553_v59 }
  0xb6   : > { %v1324_v12 = vsub.f32 %v1246_v17, %v360_v6  ;;  %v1327_v13 = vsub.f32 %v1243_v16, %v360_v6  ;;  %v353_v14 = vadd.f32 %v341_v10, %v317_v11  ;;  %v429_v15 = vsel %vm299_vm0, %v415_v8, 0.0  ;;  %986 = vmatpush3.msra.mxu1 %v553_v59 }
  0xb7   : > { %427 = vadd.xlane.f32.xlu1 %v426_v5  ;;  %395 = vadd.xlane.f32.xlu0 %v394_v7  ;;  %v397_v19 = vsel %vm299_vm0, %v383_v9, 0.0 }
  0xb8   : > { %v361_v18 = vmul.f32 0.015625, %v353_v14  ;;  %v416_v22 = vmul.f32 %v1327_v13, %v1327_v13  ;;  %v384_v23 = vmul.f32 %v1324_v12, %v1324_v12  ;;  %987 = vmatprep.subr.mxu1 %v552_v61 }
  0xb9   : > { %v344_v26 = vpop.xlane.xlu1 %343  ;;  %v320_v17 = vpop.xlane.xlu0 %319  ;;  %988 = vmatpush3.msra.mxu1 %v552_v61 }
  0xba   : > { %v1336_v27 = vsub.f32 %v1256_v21, %v361_v18  ;;  %v1339_v16 = vsub.f32 %v1253_v20, %v361_v18  ;;  %v354_v30 = vadd.f32 %v344_v26, %v320_v17  ;;  %v432_v31 = vsel %vm299_vm0, %v416_v22, 0.0 }
  0xbb   : > { %430 = vadd.xlane.f32.xlu1 %v429_v15  ;;  %398 = vadd.xlane.f32.xlu0 %v397_v19  ;;  %v400_v33 = vsel %vm299_vm0, %v384_v23, 0.0 }
  0xbc   : > { %v362_v32 = vmul.f32 0.015625, %v354_v30  ;;  %v417_v34 = vmul.f32 %v1339_v16, %v1339_v16  ;;  %v385_v35 = vmul.f32 %v1336_v27, %v1336_v27 }
  0xbd   : > { %v347_v36 = vpop.xlane.xlu1 %346  ;;  %v323_v21 = vpop.xlane.xlu0 %322 }
  0xbe   : > { %v1348_v37 = vsub.f32 %v1266_v25, %v362_v32  ;;  %v1351_v20 = vsub.f32 %v1263_v24, %v362_v32  ;;  %v355_v38 = vadd.f32 %v347_v36, %v323_v21  ;;  %v435_v39 = vsel %vm299_vm0, %v417_v34, 0.0  ;;  %v1400_v21 = vld [vmem:[%s1556_s3] ss:$0 sm:$0xff] }
  0xbf   : > { %433 = vadd.xlane.f32.xlu1 %v432_v31  ;;  %401 = vadd.xlane.f32.xlu0 %v400_v33  ;;  %v403_v41 = vsel %vm299_vm0, %v385_v35, 0.0 }
  0xc0   : > { %v363_v40 = vmul.f32 0.015625, %v355_v38  ;;  %v418_v46 = vmul.f32 %v1351_v20, %v1351_v20  ;;  %v386_v47 = vmul.f32 %v1348_v37, %v1348_v37  ;;  %v1405_v38 = vld [vmem:[%s1554_s1] ss:$0 sm:$0xff] }
  0xc2   : > { %v1360_v25 = vsub.f32 %v1276_v29, %v363_v40  ;;  %v1363_v24 = vsub.f32 %v1273_v28, %v363_v40  ;;  %v438_v48 = vsel %vm299_vm0, %v418_v46, 0.0  ;;  %v406_v49 = vsel %vm299_vm0, %v386_v47, 0.0  ;;  %v559_v28 = vld [vmem:[%s1559_s6 + $0x18] sm:$0xff]  ;;  %v1412_v47 = vld [vmem:[%s1557_s4] ss:$0 sm:$0xff] }
  0xc3   : > { %436 = vadd.xlane.f32.xlu1 %v435_v39  ;;  %404 = vadd.xlane.f32.xlu0 %v403_v41 }
  0xc4   : > { %v419_v50 = vmul.f32 %v1363_v24, %v1363_v24  ;;  %v387_v51 = vmul.f32 %v1360_v25, %v1360_v25  ;;  %961 = vmatprep.subr.mxu0 %v559_v28 }
  0xc5   : > { %962 = vmatpush3.msra.mxu0 %v559_v28 }
  0xc6   : > { %v441_v29 = vsel %vm299_vm0, %v419_v50, 0.0  ;;  %v409_v52 = vsel %vm299_vm0, %v387_v51, 0.0  ;;  %963 = vmatprep.subr.mxu0 %v558_v54 }
  0xc7   : > { %439 = vadd.xlane.f32.xlu1 %v438_v48  ;;  %407 = vadd.xlane.f32.xlu0 %v406_v49  ;;  %v1417_v48 = vld [vmem:[%s1555_s2] ss:$0 sm:$0xff] }
  0xc8   : > { %964 = vmatpush3.msra.mxu0 %v558_v54 }
  0xc9   : > { %965 = vmatprep.subr.mxu0 %v557_v56 }
  0xca   : > { %966 = vmatpush3.msra.mxu0 %v557_v56 }
  0xcb   : > { %442 = vadd.xlane.f32.xlu1 %v441_v29  ;;  %410 = vadd.xlane.f32.xlu0 %v409_v52 }
  0xcc   : > { %967 = vmatprep.subr.mxu0 %v556_v60 }
  0xcd   : > { %968 = vmatpush3.msra.mxu0 %v556_v60 }
 0x138   : > { %v422_v62 = vpop.xlane.xlu1 %421  ;;  %v390_v63 = vpop.xlane.xlu0 %389 }
 0x139   : > { %v444_v0 = vadd.f32 %v422_v62, %v390_v63 }
 0x13b   : > { %v452_v3 = vmul.f32 0.015625, %v444_v0 }
 0x13c   : > { %v425_v4 = vpop.xlane.xlu1 %424  ;;  %v393_v5 = vpop.xlane.xlu0 %392 }
 0x13d   : > { %v460_v6 = vadd.f32 1e-05, %v452_v3  ;;  %v445_v7 = vadd.f32 %v425_v4, %v393_v5 }
 0x13f   : > { %1042 = vrsqrt.f32 %v460_v6  ;;  %v453_v8 = vmul.f32 0.015625, %v445_v7 }
 0x140   : > { %v428_v9 = vpop.xlane.xlu1 %427  ;;  %v396_v10 = vpop.xlane.xlu0 %395 }
 0x141   : > { %v461_v11 = vadd.f32 1e-05, %v453_v8  ;;  %v446_v14 = vadd.f32 %v428_v9, %v396_v10 }
 0x143   : > { %1044 = vrsqrt.f32 %v461_v11  ;;  %v454_v15 = vmul.f32 0.015625, %v446_v14 }
 0x144   : > { %v431_v18 = vpop.xlane.xlu1 %430  ;;  %v399_v19 = vpop.xlane.xlu0 %398 }
 0x145   : > { %v462_v22 = vadd.f32 1e-05, %v454_v15  ;;  %v447_v23 = vadd.f32 %v431_v18, %v399_v19 }
 0x147   : > { %1046 = vrsqrt.f32 %v462_v22  ;;  %v455_v26 = vmul.f32 0.015625, %v447_v23 }
 0x148   : > { %v434_v17 = vpop.xlane.xlu1 %433  ;;  %v402_v30 = vpop.xlane.xlu0 %401 }
 0x149   : > { %v463_v31 = vadd.f32 1e-05, %v455_v26  ;;  %v448_v32 = vadd.f32 %v434_v17, %v402_v30 }
 0x14b   : > { %1048 = vrsqrt.f32 %v463_v31  ;;  %v456_v33 = vmul.f32 0.015625, %v448_v32 }
 0x14c   : > { %v1043_v34 = vpop.eup %1042  ;;  %v437_v35 = vpop.xlane.xlu1 %436 }
 0x14d   : > { %v405_v36 = vpop.xlane.xlu0 %404  ;;  %v464_v39 = vadd.f32 1e-05, %v456_v33  ;;  %v514_v41 = vmul.f32 %v1043_v34, %v1288_v45  ;;  %v476_v46 = vmul.f32 %v1043_v34, %v1286_v44 }
 0x14e   : > { %v449_v40 = vadd.f32 %v437_v35, %v405_v36 }
 0x14f   : > { %1050 = vrsqrt.f32 %v464_v39  ;;  %v529_v50 = vmul.f32 %v1400_v21, %v514_v41  ;;  %v491_v51 = vmul.f32 %v1405_v38, %v476_v46 }
 0x150   : > { %v457_v49 = vmul.f32 0.015625, %v449_v40  ;;  %v1045_v29 = vpop.eup %1044  ;;  %v440_v45 = vpop.xlane.xlu1 %439 }
 0x151   : > { %v408_v52 = vpop.xlane.xlu0 %407  ;;  %v544_v53 = vadd.f32 %v1412_v47, %v529_v50  ;;  %v506_v54 = vadd.f32 %v1417_v48, %v491_v51  ;;  %v515_v55 = vmul.f32 %v1045_v29, %v1284_v43  ;;  %v477_v56 = vmul.f32 %v1045_v29, %v1282_v42 }
 0x152   : > { %v465_v44 = vadd.f32 1e-05, %v457_v49  ;;  %v450_v28 = vadd.f32 %v440_v45, %v408_v52 }
 0x153   : > { %969 = vmatprep.mubr.msk.f32.mxu0 %vm299_vm0, %v544_v53  ;;  %989 = vmatprep.mubr.msk.f32.mxu1 %vm299_vm0, %v506_v54  ;;  %v530_v63 = vmul.f32 %v1400_v21, %v515_v55  ;;  %v492_v0 = vmul.f32 %v1405_v38, %v477_v56 }
 0x154   : > { %1052 = vrsqrt.f32 %v465_v44  ;;  %v458_v59 = vmul.f32 0.015625, %v450_v28  ;;  %v1047_v60 = vpop.eup %1046  ;;  %v443_v61 = vpop.xlane.xlu1 %442 }
 0x155   : > { %v411_v62 = vpop.xlane.xlu0 %410  ;;  %v516_v5 = vmul.f32 %v1047_v60, %v1303_v58  ;;  %v478_v43 = vmul.f32 %v1047_v60, %v1300_v57  ;;  %v545_v42 = vadd.f32 %v1412_v47, %v530_v63  ;;  %v507_v6 = vadd.f32 %v1417_v48, %v492_v0 }
 0x156   : > { %v466_v3 = vadd.f32 1e-05, %v458_v59  ;;  %v451_v4 = vadd.f32 %v443_v61, %v411_v62 }
 0x157   : > { %v531_v8 = vmul.f32 %v1400_v21, %v516_v5  ;;  %v493_v9 = vmul.f32 %v1405_v38, %v478_v43  ;;  %970 = vmatmul.mubr.msk.f32.vlgmr.msra.gmra.mxu0 %vm299_vm0, %v545_v42  ;;  %990 = vmatmul.mubr.msk.f32.vlgmr.msra.gmra.mxu1 %vm299_vm0, %v507_v6 }
 0x158   : > { %1054 = vrsqrt.f32 %v466_v3  ;;  %v459_v7 = vmul.f32 0.015625, %v451_v4  ;;  %v1049_v10 = vpop.eup %1048 }
 0x159   : > { %v546_v58 = vadd.f32 %v1412_v47, %v531_v8  ;;  %v508_v57 = vadd.f32 %v1417_v48, %v493_v9  ;;  %v517_v14 = vmul.f32 %v1049_v10, %v1314_v2  ;;  %v479_v15 = vmul.f32 %v1049_v10, %v1311_v1 }
 0x15a   : > { %v467_v11 = vadd.f32 1e-05, %v459_v7 }
 0x15b   : > { %972 = vmatprep.mubr.msk.f32.mxu0 %vm299_vm0, %v546_v58  ;;  %992 = vmatprep.mubr.msk.f32.mxu1 %vm299_vm0, %v508_v57  ;;  %v532_v18 = vmul.f32 %v1400_v21, %v517_v14  ;;  %v494_v22 = vmul.f32 %v1405_v38, %v479_v15 }
 0x15c   : > { %1056 = vrsqrt.f32 %v467_v11  ;;  %v1051_v19 = vpop.eup %1050 }
 0x15d   : > { %v547_v23 = vadd.f32 %v1412_v47, %v532_v18  ;;  %v518_v26 = vmul.f32 %v1051_v19, %v1327_v13  ;;  %v480_v17 = vmul.f32 %v1051_v19, %v1324_v12  ;;  %v509_v2 = vadd.f32 %v1417_v48, %v494_v22 }
 0x15f   : > { %973 = vmatmul.mubr.msk.f32.gmra.mxu0 %vm299_vm0, %v547_v23  ;;  %v533_v1 = vmul.f32 %v1400_v21, %v518_v26  ;;  %v495_v30 = vmul.f32 %v1405_v38, %v480_v17  ;;  %993 = vmatmul.mubr.msk.f32.gmra.mxu1 %vm299_vm0, %v509_v2 }
 0x161   : > { %v1053_v31 = vpop.eup %1052  ;;  %v548_v32 = vadd.f32 %v1412_v47, %v533_v1  ;;  %v510_v33 = vadd.f32 %v1417_v48, %v495_v30 }
 0x162   : > { %v519_v34 = vmul.f32 %v1053_v31, %v1339_v16  ;;  %v481_v13 = vmul.f32 %v1053_v31, %v1336_v27 }
 0x163   : > { %975 = vmatprep.mubr.msk.f32.mxu0 %vm299_vm0, %v548_v32  ;;  %995 = vmatprep.mubr.msk.f32.mxu1 %vm299_vm0, %v510_v33 }
 0x164   : > { %v534_v12 = vmul.f32 %v1400_v21, %v519_v34  ;;  %v496_v35 = vmul.f32 %v1405_v38, %v481_v13 }
 0x165   : > { %v1055_v36 = vpop.eup %1054 }
 0x166   : > { %v549_v39 = vadd.f32 %v1412_v47, %v534_v12  ;;  %v511_v40 = vadd.f32 %v1417_v48, %v496_v35  ;;  %v520_v41 = vmul.f32 %v1055_v36, %v1351_v20  ;;  %v482_v46 = vmul.f32 %v1055_v36, %v1348_v37 }
 0x168   : > { %976 = vmatmul.mubr.msk.f32.gmra.mxu0 %vm299_vm0, %v549_v39  ;;  %996 = vmatmul.mubr.msk.f32.gmra.mxu1 %vm299_vm0, %v511_v40  ;;  %v535_v27 = vmul.f32 %v1400_v21, %v520_v41  ;;  %v497_v16 = vmul.f32 %v1405_v38, %v482_v46 }
 0x169   : > { %v1057_v49 = vpop.eup %1056 }
 0x16a   : > { %v550_v50 = vadd.f32 %v1412_v47, %v535_v27  ;;  %v512_v51 = vadd.f32 %v1417_v48, %v497_v16  ;;  %v521_v29 = vmul.f32 %v1057_v49, %v1363_v24  ;;  %v483_v20 = vmul.f32 %v1057_v49, %v1360_v25 }
 0x16c   : > { %978 = vmatprep.mubr.msk.f32.mxu0 %vm299_vm0, %v550_v50  ;;  %998 = vmatprep.mubr.msk.f32.mxu1 %vm299_vm0, %v512_v51  ;;  %v536_v37 = vmul.f32 %v1400_v21, %v521_v29  ;;  %v498_v45 = vmul.f32 %v1405_v38, %v483_v20 }
 0x16e   : > { %v551_v52 = vadd.f32 %v1412_v47, %v536_v37  ;;  %v513_v44 = vadd.f32 %v1417_v48, %v498_v45 }
 0x170   : > { %979 = vmatmul.mubr.msk.f32.gmra.mxu0 %vm299_vm0, %v551_v52  ;;  %999 = vmatmul.mubr.msk.f32.gmra.mxu1 %vm299_vm0, %v513_v44 }
 0x217   : > { %v971_v25 = vpop.f32.mrf.mxu0  ;;  %v991_v24 = vpop.f32.mrf.mxu1 }
 0x218   : > { %v785_v28 = vadd.f32 %v991_v24, %v971_v25 }
 0x219   : > { %v650_v53 = vpop.f32.mrf.mxu0  ;;  %v779_v54 = vpop.f32.mrf.mxu1 }
 0x21a   : > { %819 = vst.msk [vmem:[%s1484_s16 + $0x8] sm:$0xff] %vm299_vm0, %v785_v28  ;;  %v780_v21 = vadd.f32 %v779_v54, %v650_v53 }
 0x21c   : > { %818 = vst.msk [vmem:[%s1484_s16] sm:$0xff] %vm299_vm0, %v780_v21 }
 0x21f   : > { %v974_v38 = vpop.f32.mrf.mxu0  ;;  %v994_v47 = vpop.f32.mrf.mxu1 }
 0x220   : > { %v795_v48 = vadd.f32 %v994_v47, %v974_v38 }
 0x221   : > { %v660_v55 = vpop.f32.mrf.mxu0  ;;  %v789_v56 = vpop.f32.mrf.mxu1 }
 0x222   : > { %821 = vst.msk [vmem:[%s1484_s16 + $0x18] sm:$0xff] %vm299_vm0, %v795_v48  ;;  %v790_v59 = vadd.f32 %v789_v56, %v660_v55 }
 0x224   : > { %820 = vst.msk [vmem:[%s1484_s16 + $0x10] sm:$0xff] %vm299_vm0, %v790_v59 }
 0x228   : > { %v977_v60 = vpop.f32.mrf.mxu0  ;;  %v997_v61 = vpop.f32.mrf.mxu1 }
 0x229   : > { %v805_v62 = vadd.f32 %v997_v61, %v977_v60 }
 0x22a   : > { %v670_v63 = vpop.f32.mrf.mxu0  ;;  %v799_v0 = vpop.f32.mrf.mxu1 }
 0x22b   : > { %823 = vst.msk [vmem:[%s1484_s16 + $0x28] sm:$0xff] %vm299_vm0, %v805_v62  ;;  %v800_v3 = vadd.f32 %v799_v0, %v670_v63 }
 0x22d   : > { %822 = vst.msk [vmem:[%s1484_s16 + $0x20] sm:$0xff] %vm299_vm0, %v800_v3 }
 0x230   : > { %v980_v4 = vpop.f32.mrf.mxu0  ;;  %v1000_v5 = vpop.f32.mrf.mxu1 }
 0x231   : > { %v815_v43 = vadd.f32 %v1000_v5, %v980_v4 }
 0x232   : > { %v680_v42 = vpop.f32.mrf.mxu0  ;;  %v809_v6 = vpop.f32.mrf.mxu1 }
 0x233   : > { %825 = vst.msk [vmem:[%s1484_s16 + $0x38] sm:$0xff] %vm299_vm0, %v815_v43  ;;  %v810_v7 = vadd.f32 %v809_v6, %v680_v42 }
 0x235   : > { %824 = vst.msk [vmem:[%s1484_s16 + $0x30] sm:$0xff] %vm299_vm0, %v810_v7 }
 0x236   : > { %1071 = shalt.err (!%p1068_p3)
}
 0x237   : > { %s1072_s9 = scalar_lea.hbm %s1503_s21, 1024  ;;  %s1076_s15 = scalar_lea.hbm %s1560_s7, 2048 }
 0x238   : > { %p1073_p4 = scmp.ne.s32.totalorder %s1503_s21, %s1072_s9  ;;  %p1077_p9 = scmp.lt.s32.totalorder %s1503_s21, %s1560_s7 }
 0x239   : > { %p1078_p10 = scmp.lt.s32.totalorder %s1076_s15, %s1072_s9 }
 0x23a   : > { %p1074_p7 = pnand %p1073_p4, %p1201_p5 }
 0x23b   : > { %p1079_p11 = por %p1078_p10, %p1077_p9 }
 0x23c   : > { %p1075_p8 = pneg %p1074_p7 }
 0x23e   : > { %p1080_p12 = pnand %p1079_p11, %p1075_p8 }
 0x240   : > { %1083 = shalt.err (!%p1080_p12)
}
 0x241   : > { %s1121_s19 = smov 128   ;;  %s1122_s20 = smov 8  }
 0x242   : > { %1001 = dma.vmem_to_hbm [thread:$0]  (%p1201_p5), %s1505_s18, 1024, %s1503_s21, %s1513_s28, %s1121_s19, %s1121_s19, %s1122_s20  }
 0x243 PF: > { %p1007_p13 = scmp.ge.s32.totalorder %s1118_s27, 2  ;;  %s855_s22 = sand.u32 1, %s1106_s24  }
 0x244   : > { %s856_s23 = scalar_lea.sflag [#allocation3], %s855_s22 }
 0x245   : > { %p1004_p0 = pnand %p1007_p13, %p1205_p6 }
 0x247   : > { %p1005_p1 = pneg %p1004_p0 }
 0x249   : > { %1101 = dma.done.wait (%p1005_p1), %s856_s23, 1024  }
 0x24a   : > { %1103 = vsyncadd (%p1005_p1), %s856_s23, 4294966272  ;;  %p17_p2 = scmp.ge.s32.totalorder %s1188_s30, 4   ;;  %s1563_s24 = smov %s1110_s25 }
 0x24b   : > { %s1564_s25 = smov %s1114_s26  ;;  %s1565_s26 = smov %s1199_s10 }
 0x24c   : > { %s1566_s27 = smov %s1188_s30  ;;  %19 = sbr.rel (!%p17_p2) target bundleno = 3 (0x3), region = 83 }
 0x251   :  { %861 = vsyncpa [#allocation3], 1 }
 0x252   :  { %863 = vsyncpa [#allocation3 + $0x1], 1 }

</bundles_post_ra>
